<compile_context>
chip_gen: v6e
topology: v6e:2x2x1
jax: 0.10.0
libtpu: 0.0.40
codegen_flags: <defaults>
</compile_context>

<pallas_src>
import functools

import jax
import jax.numpy as jnp
from jax.experimental import pallas as pl
from jax.experimental.pallas import tpu as pltpu


# ---------------------------------------------------------------------------
# Pallas kernel: recurrent part of one LSTM layer over a block of TT timesteps.
#   inputs : g    (TT, B, 4H)  pre-gates  = x_t @ W_ih^T + b_ih + b_hh
#            w_hh (H, 4H)      hidden->gates weights (transposed, gate order i,f,g,o)
#   outputs: y    (TT, B, H)   hidden state at every step of the block
#            hT   (B, H)       final hidden state (written on last grid step only)
#            cT   (B, H)       final cell state   (written on last grid step only)
#   scratch: h_scr/c_scr (B,H) f32 carried across grid iterations.
# ---------------------------------------------------------------------------
def _lstm_rec_kernel(g_ref, whh_ref, y_ref, hT_ref, cT_ref, h_scr, c_scr,
                     *, hidden, block_t, seq_len, padded):
    blk = pl.program_id(0)

    @pl.when(blk == 0)
    def _():
        # zero initial state (matches Encoder.state_zero, which is all-zeros)
        h_scr[...] = jnp.zeros_like(h_scr)
        c_scr[...] = jnp.zeros_like(c_scr)

    whh = whh_ref[...]                              # (H, 4H), resident in VMEM

    def step(s, carry):
        h_prev, c_prev = carry
        g = g_ref[s]                                # (B, 4H) pre-gates
        gates = g + jnp.dot(h_prev, whh,
                            preferred_element_type=jnp.float32)   # (B, 4H)

        i_g = jax.nn.sigmoid(gates[:, 0 * hidden:1 * hidden])
        f_g = jax.nn.sigmoid(gates[:, 1 * hidden:2 * hidden])
        g_g = jnp.tanh(gates[:, 2 * hidden:3 * hidden])
        o_g = jax.nn.sigmoid(gates[:, 3 * hidden:4 * hidden])

        c_new = f_g * c_prev + i_g * g_g
        h_new = o_g * jnp.tanh(c_new)

        if padded:  # static: only when T was padded up to a multiple of block_t
            valid = (blk * block_t + s) < seq_len
            h_new = jnp.where(valid, h_new, h_prev)
            c_new = jnp.where(valid, c_new, c_prev)

        y_ref[s] = h_new.astype(y_ref.dtype)
        return h_new, c_new

    h_fin, c_fin = jax.lax.fori_loop(
        0, block_t, step, (h_scr[...], c_scr[...]), unroll=True)

    # carry state to the next time-block
    h_scr[...] = h_fin
    c_scr[...] = c_fin

    @pl.when(blk == pl.num_programs(0) - 1)
    def _():
        hT_ref[...] = h_fin.astype(hT_ref.dtype)
        cT_ref[...] = c_fin.astype(cT_ref.dtype)


def lstm_layer_pallas(x_tbf, w_ih_t, w_hh_t, b, *, block_t=16):
    """Run one LSTM layer. x_tbf: (T, B, F) time-major. Returns (y (T,B,H), hT, cT)."""
    T, B, F = x_tbf.shape
    H4 = w_hh_t.shape[1]
    H = H4 // 4
    dtype = x_tbf.dtype

    # Hoisted input projection + folded bias: one big batched matmul (plain XLA),
    # off the latency-bound recurrent path.
    g = jnp.einsum('tbf,fg->tbg', x_tbf.astype(jnp.float32), w_ih_t) + b  # (T,B,4H)
    g = g.astype(jnp.float32)

    TT = min(block_t, T)
    n_blk = pl.cdiv(T, TT)
    T_pad = n_blk * TT
    padded = T_pad != T
    if padded:
        g = jnp.pad(g, ((0, T_pad - T), (0, 0), (0, 0)))

    kernel = functools.partial(_lstm_rec_kernel, hidden=H, block_t=TT,
                               seq_len=T, padded=padded)

    grid_spec = pltpu.PrefetchScalarGridSpec(
        num_scalar_prefetch=0,
        grid=(n_blk,),
        in_specs=[
            pl.BlockSpec((TT, B, H4), lambda t: (t, 0, 0)),   # streamed pre-gates
            pl.BlockSpec((H, H4), lambda t: (0, 0)),          # resident W_hh
        ],
        out_specs=[
            pl.BlockSpec((TT, B, H), lambda t: (t, 0, 0)),    # streamed y
            pl.BlockSpec((B, H), lambda t: (0, 0)),           # resident hT
            pl.BlockSpec((B, H), lambda t: (0, 0)),           # resident cT
        ],
        scratch_shapes=[
            pltpu.VMEM((B, H), jnp.float32),
            pltpu.VMEM((B, H), jnp.float32),
        ],
    )

    y, hT, cT = pl.pallas_call(
        kernel,
        out_shape=(
            jax.ShapeDtypeStruct((T_pad, B, H), dtype),
            jax.ShapeDtypeStruct((B, H), dtype),
            jax.ShapeDtypeStruct((B, H), dtype),
        ),
        grid_spec=grid_spec,
        compiler_params=pltpu.CompilerParams(
            dimension_semantics=("arbitrary",),  # time recurrence is sequential
        ),
    )(g, w_hh_t)

    if padded:
        y = y[:T]
    return y, hT, cT


# ---------------------------------------------------------------------------
# Encoder: multi-layer LSTM, batch_first, zero initial state (synthetic params).
# ---------------------------------------------------------------------------
class Encoder:
    def __init__(self, feature_size, hidden_size, layer_num, batch_size,
                 total_num, key):
        self.feature_size = feature_size
        self.hidden_size = hidden_size
        self.layer_num = layer_num
        self.batch_size = batch_size
        self.batch_size_fin = total_num % batch_size

        # Deterministic parameter init matching nn.LSTM shapes:
        #   layer l: w_ih (4H, in_l), w_hh (4H, H), b_ih (4H), b_hh (4H)
        bound = 1.0 / (hidden_size ** 0.5)
        self.params = []
        for layer in range(layer_num):
            in_size = feature_size if layer == 0 else hidden_size
            key, k1, k2, k3, k4 = jax.random.split(key, 5)
            w_ih = jax.random.uniform(k1, (4 * hidden_size, in_size),
                                      jnp.float32, -bound, bound)
            w_hh = jax.random.uniform(k2, (4 * hidden_size, hidden_size),
                                      jnp.float32, -bound, bound)
            b_ih = jax.random.uniform(k3, (4 * hidden_size,),
                                      jnp.float32, -bound, bound)
            b_hh = jax.random.uniform(k4, (4 * hidden_size,),
                                      jnp.float32, -bound, bound)
            self.params.append((w_ih, w_hh, b_ih, b_hh))

    def __call__(self, x):
        """x: (B, T, feature_size), batch_first like the PyTorch module.
        Returns (y (B, T, H), (h (L, B, H), c (L, B, H)))."""
        B = x.shape[0]
        if B != self.batch_size and B != self.batch_size_fin:
            raise ValueError(
                "We got wrong initial batch_size!: expected {} or {}, but got {}"
                .format(self.batch_size, self.batch_size_fin, B))

        x_tbf = jnp.transpose(x, (1, 0, 2))          # (T, B, F) time-major
        h_finals, c_finals = [], []
        for (w_ih, w_hh, b_ih, b_hh) in self.params:
            w_ih_t = jnp.transpose(w_ih)             # (in, 4H)
            w_hh_t = jnp.transpose(w_hh)             # (H, 4H)
            b = (b_ih + b_hh)[None, :]               # (1, 4H) folded bias
            x_tbf, hT, cT = lstm_layer_pallas(x_tbf, w_ih_t, w_hh_t, b)
            h_finals.append(hT)
            c_finals.append(cT)

        y = jnp.transpose(x_tbf, (1, 0, 2))          # back to (B, T, H)
        h = jnp.stack(h_finals, axis=0)              # (L, B, H)
        c = jnp.stack(c_finals, axis=0)              # (L, B, H)
        return y, (h, c)


# ---------------------------------------------------------------------------
# Pure-JAX reference (lax.scan) for correctness check.
# ---------------------------------------------------------------------------
def _lstm_layer_ref(x_tbf, w_ih, w_hh, b_ih, b_hh):
    T, B, _ = x_tbf.shape
    H = w_hh.shape[1]

    def step(carry, x_t):
        h, c = carry
        gates = x_t @ w_ih.T + h @ w_hh.T + b_ih + b_hh
        i = jax.nn.sigmoid(gates[:, 0 * H:1 * H])
        f = jax.nn.sigmoid(gates[:, 1 * H:2 * H])
        g = jnp.tanh(gates[:, 2 * H:3 * H])
        o = jax.nn.sigmoid(gates[:, 3 * H:4 * H])
        c = f * c + i * g
        h = o * jnp.tanh(c)
        return (h, c), h

    h0 = jnp.zeros((B, H), jnp.float32)
    c0 = jnp.zeros((B, H), jnp.float32)
    (hT, cT), ys = jax.lax.scan(step, (h0, c0), x_tbf)
    return ys, hT, cT


def encoder_ref(x, params):
    x_tbf = jnp.transpose(x, (1, 0, 2))
    hs, cs = [], []
    for (w_ih, w_hh, b_ih, b_hh) in params:
        x_tbf, hT, cT = _lstm_layer_ref(x_tbf, w_ih, w_hh, b_ih, b_hh)
        hs.append(hT)
        cs.append(cT)
    return jnp.transpose(x_tbf, (1, 0, 2)), (jnp.stack(hs), jnp.stack(cs))


if __name__ == "__main__":
    key = jax.random.PRNGKey(0)
    key, k_in, k_param = jax.random.split(key, 3)

    feature_size = 16
    hidden_size = 32
    layer_num = 2
    batch_size = 4
    total_num = 10        # -> batch_size_fin = 2
    seq_len = 8

    enc = Encoder(feature_size, hidden_size, layer_num, batch_size, total_num,
                  k_param)

    x = jax.random.normal(k_in, (batch_size, seq_len, feature_size), jnp.float32)

    y, (h, c) = enc(x)
    y = jax.block_until_ready(y)
    h = jax.block_until_ready(h)
    c = jax.block_until_ready(c)

    # sanity check against pure-JAX reference
    y_ref, (h_ref, c_ref) = encoder_ref(x, enc.params)
    assert y.shape == (batch_size, seq_len, hidden_size)
    assert h.shape == (layer_num, batch_size, hidden_size)
    assert c.shape == (layer_num, batch_size, hidden_size)
    assert jnp.allclose(y, y_ref, atol=1e-5, rtol=1e-5)
    assert jnp.allclose(h, h_ref, atol=1e-5, rtol=1e-5)
    assert jnp.allclose(c, c_ref, atol=1e-5, rtol=1e-5)

    print("KERNEL_OK")
</pallas_src>

<mosaic_0001>
module attributes {stable_mosaic.version = 11 : i64} {
  func.func @_lstm_rec_kernel(%arg0: i32, %arg1: memref<8x4x128xf32, #tpu.memory_space<vmem>>, %arg2: memref<32x128xf32, #tpu.memory_space<vmem>>, %arg3: memref<8x4x32xf32, #tpu.memory_space<vmem>>, %arg4: memref<4x32xf32, #tpu.memory_space<vmem>>, %arg5: memref<4x32xf32, #tpu.memory_space<vmem>>, %arg6: memref<4x32xf32, #tpu.memory_space<vmem>>, %arg7: memref<4x32xf32, #tpu.memory_space<vmem>>) attributes {dimension_semantics = [#tpu.dimension_semantics<arbitrary>], iteration_bounds = array<i64: 1>, scalar_prefetch = 0 : i64, scratch_operands = 2 : i64, tpu.core_type = #tpu.core_type<tc>, window_params = [{transform_indices = @transform_0, window_bounds = array<i64: 8, 4, 128>}, {pipeline_mode = #tpu.pipeline_mode<synchronous>, transform_indices = @transform_1, window_bounds = array<i64: 32, 128>}, {transform_indices = @transform_2, window_bounds = array<i64: 8, 4, 32>}, {pipeline_mode = #tpu.pipeline_mode<synchronous>, transform_indices = @transform_3, window_bounds = array<i64: 4, 32>}, {pipeline_mode = #tpu.pipeline_mode<synchronous>, transform_indices = @transform_4, window_bounds = array<i64: 4, 32>}]} {
    %c0_i32 = arith.constant 0 : i32
    %0 = arith.cmpi eq, %arg0, %c0_i32 : i32
    %1 = arith.extui %0 : i1 to i32
    %c0_i32_0 = arith.constant 0 : i32
    %2 = arith.cmpi ne, %1, %c0_i32_0 : i32
    scf.if %2 {
      %cst_76 = arith.constant 0.000000e+00 : f32
      %283 = vector.broadcast %cst_76 : f32 to vector<4x32xf32>
      %c0_77 = arith.constant 0 : index
      %c0_78 = arith.constant 0 : index
      %284 = vector.load %arg6[%c0_77, %c0_78] : memref<4x32xf32, #tpu.memory_space<vmem>>, vector<4x32xf32>
      tpu.vector_store %arg6[%c0_77, %c0_78], %283 {strides = array<i32>} : memref<4x32xf32, #tpu.memory_space<vmem>>, vector<4x32xf32>,
      %cst_79 = arith.constant 0.000000e+00 : f32
      %285 = vector.broadcast %cst_79 : f32 to vector<4x32xf32>
      %c0_80 = arith.constant 0 : index
      %c0_81 = arith.constant 0 : index
      %286 = vector.load %arg7[%c0_80, %c0_81] : memref<4x32xf32, #tpu.memory_space<vmem>>, vector<4x32xf32>
      tpu.vector_store %arg7[%c0_80, %c0_81], %285 {strides = array<i32>} : memref<4x32xf32, #tpu.memory_space<vmem>>, vector<4x32xf32>,
    } else {
    }
    %c0 = arith.constant 0 : index
    %c0_1 = arith.constant 0 : index
    %3 = vector.load %arg2[%c0, %c0_1] : memref<32x128xf32, #tpu.memory_space<vmem>>, vector<32x128xf32>
    %c0_2 = arith.constant 0 : index
    %c0_3 = arith.constant 0 : index
    %4 = vector.load %arg6[%c0_2, %c0_3] : memref<4x32xf32, #tpu.memory_space<vmem>>, vector<4x32xf32>
    %c0_4 = arith.constant 0 : index
    %c0_5 = arith.constant 0 : index
    %5 = vector.load %arg7[%c0_4, %c0_5] : memref<4x32xf32, #tpu.memory_space<vmem>>, vector<4x32xf32>
    %c0_i32_6 = arith.constant 0 : i32
    %6 = arith.index_cast %c0_i32_6 : i32 to index
    %c0_7 = arith.constant 0 : index
    %c0_8 = arith.constant 0 : index
    %7 = vector.load %arg1[%6, %c0_7, %c0_8] : memref<8x4x128xf32, #tpu.memory_space<vmem>>, vector<1x4x128xf32>
    %8 = vector.shape_cast %7 : vector<1x4x128xf32> to vector<4x128xf32>
    %cst = arith.constant dense<0.000000e+00> : vector<4x128xf32>
    %9 = tpu.matmul %4, %3, %cst {dimension_numbers = #tpu.dot_dimension_numbers<[1], [0], [0], [1], [0, 0, 1, 1], [], []>} : vector<4x32xf32>, vector<32x128xf32>, vector<4x128xf32> -> vector<4x128xf32>
    %10 = arith.addf %8, %9 : vector<4x128xf32>
    %11 = vector.extract_strided_slice %10 {offsets = [0, 0], sizes = [4, 32], strides = [1, 1]} : vector<4x128xf32> to vector<4x32xf32>
    %12 = arith.negf %11 : vector<4x32xf32>
    %13 = math.exp %12 : vector<4x32xf32>
    %cst_9 = arith.constant 1.000000e+00 : f32
    %14 = vector.broadcast %cst_9 : f32 to vector<4x32xf32>
    %15 = arith.addf %14, %13 : vector<4x32xf32>
    %16 = arith.divf %14, %15 : vector<4x32xf32>
    %17 = vector.extract_strided_slice %10 {offsets = [0, 32], sizes = [4, 32], strides = [1, 1]} : vector<4x128xf32> to vector<4x32xf32>
    %18 = arith.negf %17 : vector<4x32xf32>
    %19 = math.exp %18 : vector<4x32xf32>
    %cst_10 = arith.constant 1.000000e+00 : f32
    %20 = vector.broadcast %cst_10 : f32 to vector<4x32xf32>
    %21 = arith.addf %20, %19 : vector<4x32xf32>
    %22 = arith.divf %20, %21 : vector<4x32xf32>
    %23 = vector.extract_strided_slice %10 {offsets = [0, 64], sizes = [4, 32], strides = [1, 1]} : vector<4x128xf32> to vector<4x32xf32>
    %24 = math.tanh %23 : vector<4x32xf32>
    %25 = vector.extract_strided_slice %10 {offsets = [0, 96], sizes = [4, 32], strides = [1, 1]} : vector<4x128xf32> to vector<4x32xf32>
    %26 = arith.negf %25 : vector<4x32xf32>
    %27 = math.exp %26 : vector<4x32xf32>
    %cst_11 = arith.constant 1.000000e+00 : f32
    %28 = vector.broadcast %cst_11 : f32 to vector<4x32xf32>
    %29 = arith.addf %28, %27 : vector<4x32xf32>
    %30 = arith.divf %28, %29 : vector<4x32xf32>
    %31 = arith.mulf %22, %5 : vector<4x32xf32>
    %32 = arith.mulf %16, %24 : vector<4x32xf32>
    %33 = arith.addf %31, %32 : vector<4x32xf32>
    %34 = math.tanh %33 : vector<4x32xf32>
    %35 = arith.mulf %30, %34 : vector<4x32xf32>
    %36 = arith.index_cast %c0_i32_6 : i32 to index
    %c0_12 = arith.constant 0 : index
    %c0_13 = arith.constant 0 : index
    %37 = vector.load %arg3[%36, %c0_12, %c0_13] : memref<8x4x32xf32, #tpu.memory_space<vmem>>, vector<1x4x32xf32>
    %38 = vector.shape_cast %37 : vector<1x4x32xf32> to vector<4x32xf32>
    %39 = vector.shape_cast %35 : vector<4x32xf32> to vector<1x4x32xf32>
    tpu.vector_store %arg3[%36, %c0_12, %c0_13], %39 {strides = array<i32>} : memref<8x4x32xf32, #tpu.memory_space<vmem>>, vector<1x4x32xf32>,
    %c1_i32 = arith.constant 1 : i32
    %40 = arith.index_cast %c1_i32 : i32 to index
    %c0_14 = arith.constant 0 : index
    %c0_15 = arith.constant 0 : index
    %41 = vector.load %arg1[%40, %c0_14, %c0_15] : memref<8x4x128xf32, #tpu.memory_space<vmem>>, vector<1x4x128xf32>
    %42 = vector.shape_cast %41 : vector<1x4x128xf32> to vector<4x128xf32>
    %cst_16 = arith.constant dense<0.000000e+00> : vector<4x128xf32>
    %43 = tpu.matmul %35, %3, %cst_16 {dimension_numbers = #tpu.dot_dimension_numbers<[1], [0], [0], [1], [0, 0, 1, 1], [], []>} : vector<4x32xf32>, vector<32x128xf32>, vector<4x128xf32> -> vector<4x128xf32>
    %44 = arith.addf %42, %43 : vector<4x128xf32>
    %45 = vector.extract_strided_slice %44 {offsets = [0, 0], sizes = [4, 32], strides = [1, 1]} : vector<4x128xf32> to vector<4x32xf32>
    %46 = arith.negf %45 : vector<4x32xf32>
    %47 = math.exp %46 : vector<4x32xf32>
    %cst_17 = arith.constant 1.000000e+00 : f32
    %48 = vector.broadcast %cst_17 : f32 to vector<4x32xf32>
    %49 = arith.addf %48, %47 : vector<4x32xf32>
    %50 = arith.divf %48, %49 : vector<4x32xf32>
    %51 = vector.extract_strided_slice %44 {offsets = [0, 32], sizes = [4, 32], strides = [1, 1]} : vector<4x128xf32> to vector<4x32xf32>
    %52 = arith.negf %51 : vector<4x32xf32>
    %53 = math.exp %52 : vector<4x32xf32>
    %cst_18 = arith.constant 1.000000e+00 : f32
    %54 = vector.broadcast %cst_18 : f32 to vector<4x32xf32>
    %55 = arith.addf %54, %53 : vector<4x32xf32>
    %56 = arith.divf %54, %55 : vector<4x32xf32>
    %57 = vector.extract_strided_slice %44 {offsets = [0, 64], sizes = [4, 32], strides = [1, 1]} : vector<4x128xf32> to vector<4x32xf32>
    %58 = math.tanh %57 : vector<4x32xf32>
    %59 = vector.extract_strided_slice %44 {offsets = [0, 96], sizes = [4, 32], strides = [1, 1]} : vector<4x128xf32> to vector<4x32xf32>
    %60 = arith.negf %59 : vector<4x32xf32>
    %61 = math.exp %60 : vector<4x32xf32>
    %cst_19 = arith.constant 1.000000e+00 : f32
    %62 = vector.broadcast %cst_19 : f32 to vector<4x32xf32>
    %63 = arith.addf %62, %61 : vector<4x32xf32>
    %64 = arith.divf %62, %63 : vector<4x32xf32>
    %65 = arith.mulf %56, %33 : vector<4x32xf32>
    %66 = arith.mulf %50, %58 : vector<4x32xf32>
    %67 = arith.addf %65, %66 : vector<4x32xf32>
    %68 = math.tanh %67 : vector<4x32xf32>
    %69 = arith.mulf %64, %68 : vector<4x32xf32>
    %70 = arith.index_cast %c1_i32 : i32 to index
    %c0_20 = arith.constant 0 : index
    %c0_21 = arith.constant 0 : index
    %71 = vector.load %arg3[%70, %c0_20, %c0_21] : memref<8x4x32xf32, #tpu.memory_space<vmem>>, vector<1x4x32xf32>
    %72 = vector.shape_cast %71 : vector<1x4x32xf32> to vector<4x32xf32>
    %73 = vector.shape_cast %69 : vector<4x32xf32> to vector<1x4x32xf32>
    tpu.vector_store %arg3[%70, %c0_20, %c0_21], %73 {strides = array<i32>} : memref<8x4x32xf32, #tpu.memory_space<vmem>>, vector<1x4x32xf32>,
    %c2_i32 = arith.constant 2 : i32
    %74 = arith.index_cast %c2_i32 : i32 to index
    %c0_22 = arith.constant 0 : index
    %c0_23 = arith.constant 0 : index
    %75 = vector.load %arg1[%74, %c0_22, %c0_23] : memref<8x4x128xf32, #tpu.memory_space<vmem>>, vector<1x4x128xf32>
    %76 = vector.shape_cast %75 : vector<1x4x128xf32> to vector<4x128xf32>
    %cst_24 = arith.constant dense<0.000000e+00> : vector<4x128xf32>
    %77 = tpu.matmul %69, %3, %cst_24 {dimension_numbers = #tpu.dot_dimension_numbers<[1], [0], [0], [1], [0, 0, 1, 1], [], []>} : vector<4x32xf32>, vector<32x128xf32>, vector<4x128xf32> -> vector<4x128xf32>
    %78 = arith.addf %76, %77 : vector<4x128xf32>
    %79 = vector.extract_strided_slice %78 {offsets = [0, 0], sizes = [4, 32], strides = [1, 1]} : vector<4x128xf32> to vector<4x32xf32>
    %80 = arith.negf %79 : vector<4x32xf32>
    %81 = math.exp %80 : vector<4x32xf32>
    %cst_25 = arith.constant 1.000000e+00 : f32
    %82 = vector.broadcast %cst_25 : f32 to vector<4x32xf32>
    %83 = arith.addf %82, %81 : vector<4x32xf32>
    %84 = arith.divf %82, %83 : vector<4x32xf32>
    %85 = vector.extract_strided_slice %78 {offsets = [0, 32], sizes = [4, 32], strides = [1, 1]} : vector<4x128xf32> to vector<4x32xf32>
    %86 = arith.negf %85 : vector<4x32xf32>
    %87 = math.exp %86 : vector<4x32xf32>
    %cst_26 = arith.constant 1.000000e+00 : f32
    %88 = vector.broadcast %cst_26 : f32 to vector<4x32xf32>
    %89 = arith.addf %88, %87 : vector<4x32xf32>
    %90 = arith.divf %88, %89 : vector<4x32xf32>
    %91 = vector.extract_strided_slice %78 {offsets = [0, 64], sizes = [4, 32], strides = [1, 1]} : vector<4x128xf32> to vector<4x32xf32>
    %92 = math.tanh %91 : vector<4x32xf32>
    %93 = vector.extract_strided_slice %78 {offsets = [0, 96], sizes = [4, 32], strides = [1, 1]} : vector<4x128xf32> to vector<4x32xf32>
    %94 = arith.negf %93 : vector<4x32xf32>
    %95 = math.exp %94 : vector<4x32xf32>
    %cst_27 = arith.constant 1.000000e+00 : f32
    %96 = vector.broadcast %cst_27 : f32 to vector<4x32xf32>
    %97 = arith.addf %96, %95 : vector<4x32xf32>
    %98 = arith.divf %96, %97 : vector<4x32xf32>
    %99 = arith.mulf %90, %67 : vector<4x32xf32>
    %100 = arith.mulf %84, %92 : vector<4x32xf32>
    %101 = arith.addf %99, %100 : vector<4x32xf32>
    %102 = math.tanh %101 : vector<4x32xf32>
    %103 = arith.mulf %98, %102 : vector<4x32xf32>
    %104 = arith.index_cast %c2_i32 : i32 to index
    %c0_28 = arith.constant 0 : index
    %c0_29 = arith.constant 0 : index
    %105 = vector.load %arg3[%104, %c0_28, %c0_29] : memref<8x4x32xf32, #tpu.memory_space<vmem>>, vector<1x4x32xf32>
    %106 = vector.shape_cast %105 : vector<1x4x32xf32> to vector<4x32xf32>
    %107 = vector.shape_cast %103 : vector<4x32xf32> to vector<1x4x32xf32>
    tpu.vector_store %arg3[%104, %c0_28, %c0_29], %107 {strides = array<i32>} : memref<8x4x32xf32, #tpu.memory_space<vmem>>, vector<1x4x32xf32>,
    %c3_i32 = arith.constant 3 : i32
    %108 = arith.index_cast %c3_i32 : i32 to index
    %c0_30 = arith.constant 0 : index
    %c0_31 = arith.constant 0 : index
    %109 = vector.load %arg1[%108, %c0_30, %c0_31] : memref<8x4x128xf32, #tpu.memory_space<vmem>>, vector<1x4x128xf32>
    %110 = vector.shape_cast %109 : vector<1x4x128xf32> to vector<4x128xf32>
    %cst_32 = arith.constant dense<0.000000e+00> : vector<4x128xf32>
    %111 = tpu.matmul %103, %3, %cst_32 {dimension_numbers = #tpu.dot_dimension_numbers<[1], [0], [0], [1], [0, 0, 1, 1], [], []>} : vector<4x32xf32>, vector<32x128xf32>, vector<4x128xf32> -> vector<4x128xf32>
    %112 = arith.addf %110, %111 : vector<4x128xf32>
    %113 = vector.extract_strided_slice %112 {offsets = [0, 0], sizes = [4, 32], strides = [1, 1]} : vector<4x128xf32> to vector<4x32xf32>
    %114 = arith.negf %113 : vector<4x32xf32>
    %115 = math.exp %114 : vector<4x32xf32>
    %cst_33 = arith.constant 1.000000e+00 : f32
    %116 = vector.broadcast %cst_33 : f32 to vector<4x32xf32>
    %117 = arith.addf %116, %115 : vector<4x32xf32>
    %118 = arith.divf %116, %117 : vector<4x32xf32>
    %119 = vector.extract_strided_slice %112 {offsets = [0, 32], sizes = [4, 32], strides = [1, 1]} : vector<4x128xf32> to vector<4x32xf32>
    %120 = arith.negf %119 : vector<4x32xf32>
    %121 = math.exp %120 : vector<4x32xf32>
    %cst_34 = arith.constant 1.000000e+00 : f32
    %122 = vector.broadcast %cst_34 : f32 to vector<4x32xf32>
    %123 = arith.addf %122, %121 : vector<4x32xf32>
    %124 = arith.divf %122, %123 : vector<4x32xf32>
    %125 = vector.extract_strided_slice %112 {offsets = [0, 64], sizes = [4, 32], strides = [1, 1]} : vector<4x128xf32> to vector<4x32xf32>
    %126 = math.tanh %125 : vector<4x32xf32>
    %127 = vector.extract_strided_slice %112 {offsets = [0, 96], sizes = [4, 32], strides = [1, 1]} : vector<4x128xf32> to vector<4x32xf32>
    %128 = arith.negf %127 : vector<4x32xf32>
    %129 = math.exp %128 : vector<4x32xf32>
    %cst_35 = arith.constant 1.000000e+00 : f32
    %130 = vector.broadcast %cst_35 : f32 to vector<4x32xf32>
    %131 = arith.addf %130, %129 : vector<4x32xf32>
    %132 = arith.divf %130, %131 : vector<4x32xf32>
    %133 = arith.mulf %124, %101 : vector<4x32xf32>
    %134 = arith.mulf %118, %126 : vector<4x32xf32>
    %135 = arith.addf %133, %134 : vector<4x32xf32>
    %136 = math.tanh %135 : vector<4x32xf32>
    %137 = arith.mulf %132, %136 : vector<4x32xf32>
    %138 = arith.index_cast %c3_i32 : i32 to index
    %c0_36 = arith.constant 0 : index
    %c0_37 = arith.constant 0 : index
    %139 = vector.load %arg3[%138, %c0_36, %c0_37] : memref<8x4x32xf32, #tpu.memory_space<vmem>>, vector<1x4x32xf32>
    %140 = vector.shape_cast %139 : vector<1x4x32xf32> to vector<4x32xf32>
    %141 = vector.shape_cast %137 : vector<4x32xf32> to vector<1x4x32xf32>
    tpu.vector_store %arg3[%138, %c0_36, %c0_37], %141 {strides = array<i32>} : memref<8x4x32xf32, #tpu.memory_space<vmem>>, vector<1x4x32xf32>,
    %c4_i32 = arith.constant 4 : i32
    %142 = arith.index_cast %c4_i32 : i32 to index
    %c0_38 = arith.constant 0 : index
    %c0_39 = arith.constant 0 : index
    %143 = vector.load %arg1[%142, %c0_38, %c0_39] : memref<8x4x128xf32, #tpu.memory_space<vmem>>, vector<1x4x128xf32>
    %144 = vector.shape_cast %143 : vector<1x4x128xf32> to vector<4x128xf32>
    %cst_40 = arith.constant dense<0.000000e+00> : vector<4x128xf32>
    %145 = tpu.matmul %137, %3, %cst_40 {dimension_numbers = #tpu.dot_dimension_numbers<[1], [0], [0], [1], [0, 0, 1, 1], [], []>} : vector<4x32xf32>, vector<32x128xf32>, vector<4x128xf32> -> vector<4x128xf32>
    %146 = arith.addf %144, %145 : vector<4x128xf32>
    %147 = vector.extract_strided_slice %146 {offsets = [0, 0], sizes = [4, 32], strides = [1, 1]} : vector<4x128xf32> to vector<4x32xf32>
    %148 = arith.negf %147 : vector<4x32xf32>
    %149 = math.exp %148 : vector<4x32xf32>
    %cst_41 = arith.constant 1.000000e+00 : f32
    %150 = vector.broadcast %cst_41 : f32 to vector<4x32xf32>
    %151 = arith.addf %150, %149 : vector<4x32xf32>
    %152 = arith.divf %150, %151 : vector<4x32xf32>
    %153 = vector.extract_strided_slice %146 {offsets = [0, 32], sizes = [4, 32], strides = [1, 1]} : vector<4x128xf32> to vector<4x32xf32>
    %154 = arith.negf %153 : vector<4x32xf32>
    %155 = math.exp %154 : vector<4x32xf32>
    %cst_42 = arith.constant 1.000000e+00 : f32
    %156 = vector.broadcast %cst_42 : f32 to vector<4x32xf32>
    %157 = arith.addf %156, %155 : vector<4x32xf32>
    %158 = arith.divf %156, %157 : vector<4x32xf32>
    %159 = vector.extract_strided_slice %146 {offsets = [0, 64], sizes = [4, 32], strides = [1, 1]} : vector<4x128xf32> to vector<4x32xf32>
    %160 = math.tanh %159 : vector<4x32xf32>
    %161 = vector.extract_strided_slice %146 {offsets = [0, 96], sizes = [4, 32], strides = [1, 1]} : vector<4x128xf32> to vector<4x32xf32>
    %162 = arith.negf %161 : vector<4x32xf32>
    %163 = math.exp %162 : vector<4x32xf32>
    %cst_43 = arith.constant 1.000000e+00 : f32
    %164 = vector.broadcast %cst_43 : f32 to vector<4x32xf32>
    %165 = arith.addf %164, %163 : vector<4x32xf32>
    %166 = arith.divf %164, %165 : vector<4x32xf32>
    %167 = arith.mulf %158, %135 : vector<4x32xf32>
    %168 = arith.mulf %152, %160 : vector<4x32xf32>
    %169 = arith.addf %167, %168 : vector<4x32xf32>
    %170 = math.tanh %169 : vector<4x32xf32>
    %171 = arith.mulf %166, %170 : vector<4x32xf32>
    %172 = arith.index_cast %c4_i32 : i32 to index
    %c0_44 = arith.constant 0 : index
    %c0_45 = arith.constant 0 : index
    %173 = vector.load %arg3[%172, %c0_44, %c0_45] : memref<8x4x32xf32, #tpu.memory_space<vmem>>, vector<1x4x32xf32>
    %174 = vector.shape_cast %173 : vector<1x4x32xf32> to vector<4x32xf32>
    %175 = vector.shape_cast %171 : vector<4x32xf32> to vector<1x4x32xf32>
    tpu.vector_store %arg3[%172, %c0_44, %c0_45], %175 {strides = array<i32>} : memref<8x4x32xf32, #tpu.memory_space<vmem>>, vector<1x4x32xf32>,
    %c5_i32 = arith.constant 5 : i32
    %176 = arith.index_cast %c5_i32 : i32 to index
    %c0_46 = arith.constant 0 : index
    %c0_47 = arith.constant 0 : index
    %177 = vector.load %arg1[%176, %c0_46, %c0_47] : memref<8x4x128xf32, #tpu.memory_space<vmem>>, vector<1x4x128xf32>
    %178 = vector.shape_cast %177 : vector<1x4x128xf32> to vector<4x128xf32>
    %cst_48 = arith.constant dense<0.000000e+00> : vector<4x128xf32>
    %179 = tpu.matmul %171, %3, %cst_48 {dimension_numbers = #tpu.dot_dimension_numbers<[1], [0], [0], [1], [0, 0, 1, 1], [], []>} : vector<4x32xf32>, vector<32x128xf32>, vector<4x128xf32> -> vector<4x128xf32>
    %180 = arith.addf %178, %179 : vector<4x128xf32>
    %181 = vector.extract_strided_slice %180 {offsets = [0, 0], sizes = [4, 32], strides = [1, 1]} : vector<4x128xf32> to vector<4x32xf32>
    %182 = arith.negf %181 : vector<4x32xf32>
    %183 = math.exp %182 : vector<4x32xf32>
    %cst_49 = arith.constant 1.000000e+00 : f32
    %184 = vector.broadcast %cst_49 : f32 to vector<4x32xf32>
    %185 = arith.addf %184, %183 : vector<4x32xf32>
    %186 = arith.divf %184, %185 : vector<4x32xf32>
    %187 = vector.extract_strided_slice %180 {offsets = [0, 32], sizes = [4, 32], strides = [1, 1]} : vector<4x128xf32> to vector<4x32xf32>
    %188 = arith.negf %187 : vector<4x32xf32>
    %189 = math.exp %188 : vector<4x32xf32>
    %cst_50 = arith.constant 1.000000e+00 : f32
    %190 = vector.broadcast %cst_50 : f32 to vector<4x32xf32>
    %191 = arith.addf %190, %189 : vector<4x32xf32>
    %192 = arith.divf %190, %191 : vector<4x32xf32>
    %193 = vector.extract_strided_slice %180 {offsets = [0, 64], sizes = [4, 32], strides = [1, 1]} : vector<4x128xf32> to vector<4x32xf32>
    %194 = math.tanh %193 : vector<4x32xf32>
    %195 = vector.extract_strided_slice %180 {offsets = [0, 96], sizes = [4, 32], strides = [1, 1]} : vector<4x128xf32> to vector<4x32xf32>
    %196 = arith.negf %195 : vector<4x32xf32>
    %197 = math.exp %196 : vector<4x32xf32>
    %cst_51 = arith.constant 1.000000e+00 : f32
    %198 = vector.broadcast %cst_51 : f32 to vector<4x32xf32>
    %199 = arith.addf %198, %197 : vector<4x32xf32>
    %200 = arith.divf %198, %199 : vector<4x32xf32>
    %201 = arith.mulf %192, %169 : vector<4x32xf32>
    %202 = arith.mulf %186, %194 : vector<4x32xf32>
    %203 = arith.addf %201, %202 : vector<4x32xf32>
    %204 = math.tanh %203 : vector<4x32xf32>
    %205 = arith.mulf %200, %204 : vector<4x32xf32>
    %206 = arith.index_cast %c5_i32 : i32 to index
    %c0_52 = arith.constant 0 : index
    %c0_53 = arith.constant 0 : index
    %207 = vector.load %arg3[%206, %c0_52, %c0_53] : memref<8x4x32xf32, #tpu.memory_space<vmem>>, vector<1x4x32xf32>
    %208 = vector.shape_cast %207 : vector<1x4x32xf32> to vector<4x32xf32>
    %209 = vector.shape_cast %205 : vector<4x32xf32> to vector<1x4x32xf32>
    tpu.vector_store %arg3[%206, %c0_52, %c0_53], %209 {strides = array<i32>} : memref<8x4x32xf32, #tpu.memory_space<vmem>>, vector<1x4x32xf32>,
    %c6_i32 = arith.constant 6 : i32
    %210 = arith.index_cast %c6_i32 : i32 to index
    %c0_54 = arith.constant 0 : index
    %c0_55 = arith.constant 0 : index
    %211 = vector.load %arg1[%210, %c0_54, %c0_55] : memref<8x4x128xf32, #tpu.memory_space<vmem>>, vector<1x4x128xf32>
    %212 = vector.shape_cast %211 : vector<1x4x128xf32> to vector<4x128xf32>
    %cst_56 = arith.constant dense<0.000000e+00> : vector<4x128xf32>
    %213 = tpu.matmul %205, %3, %cst_56 {dimension_numbers = #tpu.dot_dimension_numbers<[1], [0], [0], [1], [0, 0, 1, 1], [], []>} : vector<4x32xf32>, vector<32x128xf32>, vector<4x128xf32> -> vector<4x128xf32>
    %214 = arith.addf %212, %213 : vector<4x128xf32>
    %215 = vector.extract_strided_slice %214 {offsets = [0, 0], sizes = [4, 32], strides = [1, 1]} : vector<4x128xf32> to vector<4x32xf32>
    %216 = arith.negf %215 : vector<4x32xf32>
    %217 = math.exp %216 : vector<4x32xf32>
    %cst_57 = arith.constant 1.000000e+00 : f32
    %218 = vector.broadcast %cst_57 : f32 to vector<4x32xf32>
    %219 = arith.addf %218, %217 : vector<4x32xf32>
    %220 = arith.divf %218, %219 : vector<4x32xf32>
    %221 = vector.extract_strided_slice %214 {offsets = [0, 32], sizes = [4, 32], strides = [1, 1]} : vector<4x128xf32> to vector<4x32xf32>
    %222 = arith.negf %221 : vector<4x32xf32>
    %223 = math.exp %222 : vector<4x32xf32>
    %cst_58 = arith.constant 1.000000e+00 : f32
    %224 = vector.broadcast %cst_58 : f32 to vector<4x32xf32>
    %225 = arith.addf %224, %223 : vector<4x32xf32>
    %226 = arith.divf %224, %225 : vector<4x32xf32>
    %227 = vector.extract_strided_slice %214 {offsets = [0, 64], sizes = [4, 32], strides = [1, 1]} : vector<4x128xf32> to vector<4x32xf32>
    %228 = math.tanh %227 : vector<4x32xf32>
    %229 = vector.extract_strided_slice %214 {offsets = [0, 96], sizes = [4, 32], strides = [1, 1]} : vector<4x128xf32> to vector<4x32xf32>
    %230 = arith.negf %229 : vector<4x32xf32>
    %231 = math.exp %230 : vector<4x32xf32>
    %cst_59 = arith.constant 1.000000e+00 : f32
    %232 = vector.broadcast %cst_59 : f32 to vector<4x32xf32>
    %233 = arith.addf %232, %231 : vector<4x32xf32>
    %234 = arith.divf %232, %233 : vector<4x32xf32>
    %235 = arith.mulf %226, %203 : vector<4x32xf32>
    %236 = arith.mulf %220, %228 : vector<4x32xf32>
    %237 = arith.addf %235, %236 : vector<4x32xf32>
    %238 = math.tanh %237 : vector<4x32xf32>
    %239 = arith.mulf %234, %238 : vector<4x32xf32>
    %240 = arith.index_cast %c6_i32 : i32 to index
    %c0_60 = arith.constant 0 : index
    %c0_61 = arith.constant 0 : index
    %241 = vector.load %arg3[%240, %c0_60, %c0_61] : memref<8x4x32xf32, #tpu.memory_space<vmem>>, vector<1x4x32xf32>
    %242 = vector.shape_cast %241 : vector<1x4x32xf32> to vector<4x32xf32>
    %243 = vector.shape_cast %239 : vector<4x32xf32> to vector<1x4x32xf32>
    tpu.vector_store %arg3[%240, %c0_60, %c0_61], %243 {strides = array<i32>} : memref<8x4x32xf32, #tpu.memory_space<vmem>>, vector<1x4x32xf32>,
    %c7_i32 = arith.constant 7 : i32
    %244 = arith.index_cast %c7_i32 : i32 to index
    %c0_62 = arith.constant 0 : index
    %c0_63 = arith.constant 0 : index
    %245 = vector.load %arg1[%244, %c0_62, %c0_63] : memref<8x4x128xf32, #tpu.memory_space<vmem>>, vector<1x4x128xf32>
    %246 = vector.shape_cast %245 : vector<1x4x128xf32> to vector<4x128xf32>
    %cst_64 = arith.constant dense<0.000000e+00> : vector<4x128xf32>
    %247 = tpu.matmul %239, %3, %cst_64 {dimension_numbers = #tpu.dot_dimension_numbers<[1], [0], [0], [1], [0, 0, 1, 1], [], []>} : vector<4x32xf32>, vector<32x128xf32>, vector<4x128xf32> -> vector<4x128xf32>
    %248 = arith.addf %246, %247 : vector<4x128xf32>
    %249 = vector.extract_strided_slice %248 {offsets = [0, 0], sizes = [4, 32], strides = [1, 1]} : vector<4x128xf32> to vector<4x32xf32>
    %250 = arith.negf %249 : vector<4x32xf32>
    %251 = math.exp %250 : vector<4x32xf32>
    %cst_65 = arith.constant 1.000000e+00 : f32
    %252 = vector.broadcast %cst_65 : f32 to vector<4x32xf32>
    %253 = arith.addf %252, %251 : vector<4x32xf32>
    %254 = arith.divf %252, %253 : vector<4x32xf32>
    %255 = vector.extract_strided_slice %248 {offsets = [0, 32], sizes = [4, 32], strides = [1, 1]} : vector<4x128xf32> to vector<4x32xf32>
    %256 = arith.negf %255 : vector<4x32xf32>
    %257 = math.exp %256 : vector<4x32xf32>
    %cst_66 = arith.constant 1.000000e+00 : f32
    %258 = vector.broadcast %cst_66 : f32 to vector<4x32xf32>
    %259 = arith.addf %258, %257 : vector<4x32xf32>
    %260 = arith.divf %258, %259 : vector<4x32xf32>
    %261 = vector.extract_strided_slice %248 {offsets = [0, 64], sizes = [4, 32], strides = [1, 1]} : vector<4x128xf32> to vector<4x32xf32>
    %262 = math.tanh %261 : vector<4x32xf32>
    %263 = vector.extract_strided_slice %248 {offsets = [0, 96], sizes = [4, 32], strides = [1, 1]} : vector<4x128xf32> to vector<4x32xf32>
    %264 = arith.negf %263 : vector<4x32xf32>
    %265 = math.exp %264 : vector<4x32xf32>
    %cst_67 = arith.constant 1.000000e+00 : f32
    %266 = vector.broadcast %cst_67 : f32 to vector<4x32xf32>
    %267 = arith.addf %266, %265 : vector<4x32xf32>
    %268 = arith.divf %266, %267 : vector<4x32xf32>
    %269 = arith.mulf %260, %237 : vector<4x32xf32>
    %270 = arith.mulf %254, %262 : vector<4x32xf32>
    %271 = arith.addf %269, %270 : vector<4x32xf32>
    %272 = math.tanh %271 : vector<4x32xf32>
    %273 = arith.mulf %268, %272 : vector<4x32xf32>
    %274 = arith.index_cast %c7_i32 : i32 to index
    %c0_68 = arith.constant 0 : index
    %c0_69 = arith.constant 0 : index
    %275 = vector.load %arg3[%274, %c0_68, %c0_69] : memref<8x4x32xf32, #tpu.memory_space<vmem>>, vector<1x4x32xf32>
    %276 = vector.shape_cast %275 : vector<1x4x32xf32> to vector<4x32xf32>
    %277 = vector.shape_cast %273 : vector<4x32xf32> to vector<1x4x32xf32>
    tpu.vector_store %arg3[%274, %c0_68, %c0_69], %277 {strides = array<i32>} : memref<8x4x32xf32, #tpu.memory_space<vmem>>, vector<1x4x32xf32>,
    %c8_i32 = arith.constant 8 : i32
    %c0_70 = arith.constant 0 : index
    %c0_71 = arith.constant 0 : index
    %278 = vector.load %arg6[%c0_70, %c0_71] : memref<4x32xf32, #tpu.memory_space<vmem>>, vector<4x32xf32>
    tpu.vector_store %arg6[%c0_70, %c0_71], %273 {strides = array<i32>} : memref<4x32xf32, #tpu.memory_space<vmem>>, vector<4x32xf32>,
    %c0_72 = arith.constant 0 : index
    %c0_73 = arith.constant 0 : index
    %279 = vector.load %arg7[%c0_72, %c0_73] : memref<4x32xf32, #tpu.memory_space<vmem>>, vector<4x32xf32>
    tpu.vector_store %arg7[%c0_72, %c0_73], %271 {strides = array<i32>} : memref<4x32xf32, #tpu.memory_space<vmem>>, vector<4x32xf32>,
    %c0_i32_74 = arith.constant 0 : i32
    %280 = arith.cmpi eq, %arg0, %c0_i32_74 : i32
    %281 = arith.extui %280 : i1 to i32
    %c0_i32_75 = arith.constant 0 : i32
    %282 = arith.cmpi ne, %281, %c0_i32_75 : i32
    scf.if %282 {
      %c0_76 = arith.constant 0 : index
      %c0_77 = arith.constant 0 : index
      %283 = vector.load %arg4[%c0_76, %c0_77] : memref<4x32xf32, #tpu.memory_space<vmem>>, vector<4x32xf32>
      tpu.vector_store %arg4[%c0_76, %c0_77], %273 {strides = array<i32>} : memref<4x32xf32, #tpu.memory_space<vmem>>, vector<4x32xf32>,
      %c0_78 = arith.constant 0 : index
      %c0_79 = arith.constant 0 : index
      %284 = vector.load %arg5[%c0_78, %c0_79] : memref<4x32xf32, #tpu.memory_space<vmem>>, vector<4x32xf32>
      tpu.vector_store %arg5[%c0_78, %c0_79], %271 {strides = array<i32>} : memref<4x32xf32, #tpu.memory_space<vmem>>, vector<4x32xf32>,
    } else {
    }
    return
  }
  func.func @transform_0(%arg0: i32) -> (i32, i32, i32) {
    %c0_i32 = arith.constant 0 : i32
    %c0_i32_0 = arith.constant 0 : i32
    %c0_i32_1 = arith.constant 0 : i32
    return %arg0, %c0_i32, %c0_i32_0 : i32, i32, i32
  }
  func.func @transform_1(%arg0: i32) -> (i32, i32) {
    %c0_i32 = arith.constant 0 : i32
    %c0_i32_0 = arith.constant 0 : i32
    %c0_i32_1 = arith.constant 0 : i32
    return %c0_i32, %c0_i32_0 : i32, i32
  }
  func.func @transform_2(%arg0: i32) -> (i32, i32, i32) {
    %c0_i32 = arith.constant 0 : i32
    %c0_i32_0 = arith.constant 0 : i32
    %c0_i32_1 = arith.constant 0 : i32
    return %arg0, %c0_i32, %c0_i32_0 : i32, i32, i32
  }
  func.func @transform_3(%arg0: i32) -> (i32, i32) {
    %c0_i32 = arith.constant 0 : i32
    %c0_i32_0 = arith.constant 0 : i32
    %c0_i32_1 = arith.constant 0 : i32
    return %c0_i32, %c0_i32_0 : i32, i32
  }
  func.func @transform_4(%arg0: i32) -> (i32, i32) {
    %c0_i32 = arith.constant 0 : i32
    %c0_i32_0 = arith.constant 0 : i32
    %c0_i32_1 = arith.constant 0 : i32
    return %c0_i32, %c0_i32_0 : i32, i32
  }
}

</mosaic_0001>

<bundles_post_ra>
// kernel: tpu_custom_call.1
= control target key start
LH: loop header
LB: loop body
LE: loop exit
PB: predicated region body
PF: predicated region fallthrough
CT: control target
= control target key end

     0   :  { %10 = vsyncpa [#allocation5], 0  ;;  %s1491_s0 = inlined_call_operand.hbm [shape: f32[8,4,128], index: 0, kind: input, shape index: {}]   ;;  %s1492_s1 = inlined_call_operand.hbm [shape: f32[32,128], index: 1, kind: input, shape index: {}]   ;;  %s1493_s2 = inlined_call_operand.hbm [shape: f32[8,4,32], index: 2, kind: output, shape index: {0}]   ;;  %s1494_s3 = inlined_call_operand.hbm [shape: f32[4,32], index: 3, kind: output, shape index: {1}]   ;;  %s1495_s4 = inlined_call_operand.hbm [shape: f32[4,32], index: 4, kind: output, shape index: {2}]  }
   0x1   :  { %11 = vsyncpa [#allocation8], 0 }
   0x2   :  { %12 = vsyncpa [#allocation6], 0 }
   0x3   :  { %13 = vsyncpa [#allocation11], 0  ;;  %s1287_s15 = smov [#allocation4]  }
   0x4   :  { %s19_s16 = sshll.u32 %s1287_s15, 4  ;;  %s20_s16 = int_to_ptr.vmem [resolvable:$true] %s19_s16 }
   0x5   :  { %s1187_s17 = scalar_lea.vmem %s20_s16, 512  ;;  %p1192_p1 = scmp.lt.s32.totalorder %s20_s16, %s20_s16 }
   0x6   :  { %p1188_p0 = scmp.ne.s32.totalorder %s20_s16, %s1187_s17  ;;  %p1193_p2 = scmp.lt.s32.totalorder %s1187_s17, %s1187_s17 }
   0x8   :  { %p1194_p3 = por %p1193_p2, %p1192_p1 }
   0xa   :  { %p1195_p4 = pnand %p1194_p3, %p1188_p0 }
   0xc   :  { %1198 = shalt.err (!%p1195_p4)
}
   0xd   :  { %s1288_s18 = smov 64   ;;  %s1289_s19 = smov 4  }
   0xe   :  { %25 = dma.hbm_to_vmem [thread:$0]  %s1491_s0, 512, %s20_s16, [#allocation5], %s1288_s18, %s1288_s18, %s1289_s19  }
   0xf   :  { %s1290_s22 = smov [#allocation7]  }
  0x10   :  { %s31_s23 = sshll.u32 %s1290_s22, 4  ;;  %s32_s23 = int_to_ptr.vmem [resolvable:$true] %s31_s23 }
  0x11   :  { %s1207_s24 = scalar_lea.vmem %s32_s23, 512  ;;  %p1212_p6 = scmp.lt.s32.totalorder %s32_s23, %s32_s23 }
  0x12   :  { %p1208_p5 = scmp.ne.s32.totalorder %s32_s23, %s1207_s24  ;;  %p1213_p7 = scmp.lt.s32.totalorder %s1207_s24, %s1207_s24 }
  0x14   :  { %p1214_p8 = por %p1213_p7, %p1212_p6 }
  0x16   :  { %p1215_p9 = pnand %p1214_p8, %p1208_p5 }
  0x18   :  { %1218 = shalt.err (!%p1215_p9)
}
  0x19   :  { %s1291_s25 = smov 128   ;;  %s1292_s26 = smov 8  }
  0x1a   :  { %37 = dma.hbm_to_vmem [thread:$0]  %s1492_s1, 512, %s32_s23, [#allocation8], %s1291_s25, %s1291_s25, %s1292_s26  }
  0x1b   :  { %1279 = dma.done.wait [#allocation5], 512  }
  0x1c   :  { %1280 = vsyncadd [#allocation5], 4294966784 }
  0x1d   :  { %1281 = dma.done.wait [#allocation8], 512  }
  0x1e   :  { %1282 = vsyncadd [#allocation8], 4294966784  ;;  %vm48_vm0 = vcmask 257024   ;;  %v1293_v0 = vmov 0.0   ;;  %vm1294_vm1 = vmmov 0   ;;  %v1344_v1 = vld [vmem:[#allocation7 + $0x18] sm:$0xff] }
  0x1f   :  { %1014 = vmatprep.subr.mxu0 %v1293_v0  ;;  %1022 = vmatprep.mubr.msk.f32.mxu0 %vm1294_vm1, %v1293_v0  ;;  %49 = vst.msk [vmem:[#allocation2] sm:$0xf] %vm48_vm0, %v1293_v0  ;;  %50 = vst.msk [vmem:[#allocation3] sm:$0xf] %vm48_vm0, %v1293_v0  ;;  %v1346_v2 = vld [vmem:[#allocation7 + $0x10] sm:$0xff]  ;;  %v1351_v3 = vld [vmem:[#allocation7 + $0x8] sm:$0xff] }
  0x20   :  { %1025 = vmatprep.subr.mxu1 %v1293_v0  ;;  %1033 = vmatprep.mubr.msk.f32.mxu1 %vm1294_vm1, %v1293_v0  ;;  %v1357_v4 = vld [vmem:[#allocation7] sm:$0xff]  ;;  %vm58_vm2 = vcmask 261120   ;;  %s1295_s0 = smov 32   ;;  %v273_v44 = vld [vmem:[#allocation4 + $0x8] sm:$0xf]  ;;  %s1296_s1 = smov 96  }
  0x21   :  { %1015 = vmatpush3.msra.mxu0 %v1344_v1  ;;  %1026 = vmatpush3.msra.mxu1 %v1344_v1  ;;  %v57_v6 = vld [vmem:[#allocation4] sm:$0xf]  ;;  %v168_v26 = vld [vmem:[#allocation4 + $0x4] sm:$0xf]  ;;  %v378_v62 = vld [vmem:[#allocation4 + $0xc] sm:$0xf] }
  0x22   :  { %1016 = vmatprep.subr.mxu0 %v1293_v0  ;;  %1027 = vmatprep.subr.mxu1 %v1293_v0  ;;  %s1297_s29 = smov [#allocation10]   ;;  %s1298_s5 = smov [#allocation9]  }
  0x23   :  { %1017 = vmatpush3.msra.mxu0 %v1346_v2  ;;  %1028 = vmatpush3.msra.mxu1 %v1346_v2  ;;  %s931_s30 = sshll.u32 %s1297_s29, 4  ;;  %s918_s6 = sshll.u32 %s1298_s5, 4  ;;  %s932_s30 = int_to_ptr.vmem [resolvable:$true] %s931_s30  ;;  %s919_s6 = int_to_ptr.vmem [resolvable:$true] %s918_s6 }
  0x24   :  { %1018 = vmatprep.subr.mxu0 %v1293_v0  ;;  %1029 = vmatprep.subr.mxu1 %v1293_v0  ;;  %s1299_s7 = smov [#allocation12]   ;;  %s1219_s9 = scalar_lea.vmem %s932_s30, 64 }
  0x25   :  { %1019 = vmatpush3.msra.mxu0 %v1351_v3  ;;  %1030 = vmatpush3.msra.mxu1 %v1351_v3  ;;  %s941_s8 = sshll.u32 %s1299_s7, 4  ;;  %p1220_p10 = scmp.ne.s32.totalorder %s932_s30, %s1219_s9  ;;  %s942_s8 = int_to_ptr.vmem [resolvable:$true] %s941_s8 }
  0x26   :  { %v55_v5 = vld [vmem:[#allocation2] sm:$0xf]  ;;  %1020 = vmatprep.subr.mxu0 %v1293_v0  ;;  %1031 = vmatprep.subr.mxu1 %v1293_v0  ;;  %v56_v11 = vld [vmem:[#allocation3] sm:$0xf]  ;;  %p1224_p11 = scmp.lt.s32.totalorder %s932_s30, %s932_s30  ;;  %p1225_p12 = scmp.lt.s32.totalorder %s1219_s9, %s1219_s9 }
  0x27   :  { %1021 = vmatpush3.msra.mxu0 %v1357_v4  ;;  %1032 = vmatpush3.msra.mxu1 %v1357_v4 }
  0x28   :  { %1023 = vmatmul.mubr.msk.f32.vlgmr.msra.gmra.mxu0 %vm58_vm2, %v55_v5  ;;  %1036 = vmatprep.subr.mxu0 %v1293_v0  ;;  %p1226_p13 = por %p1225_p12, %p1224_p11 }
  0x29   :  { %1037 = vmatpush3.msra.mxu0 %v1344_v1  ;;  %1044 = vmatprep.mubr.msk.f32.mxu0 %vm1294_vm1, %v1293_v0 }
  0x2a   :  { %1038 = vmatprep.subr.mxu0 %v1293_v0  ;;  %1047 = vmatprep.subr.mxu1 %v1293_v0  ;;  %p1227_p0 = pnand %p1226_p13, %p1220_p10 }
  0x2b   :  { %1039 = vmatpush3.msra.mxu0 %v1346_v2 }
  0x2c   :  { %1040 = vmatprep.subr.mxu0 %v1293_v0 }
  0x2d   :  { %1041 = vmatpush3.msra.mxu0 %v1351_v3 }
  0x2e   :  { %1042 = vmatprep.subr.mxu0 %v1293_v0 }
  0x2f   :  { %1043 = vmatpush3.msra.mxu0 %v1357_v4 }
  0x30   :  { %1058 = vmatprep.subr.mxu0 %v1293_v0 }
  0xe8   :  { %v128_v7 = vpop.f32.mrf.mxu0 }
  0xe9   :  { %v132_v8 = vadd.f32 %v128_v7, %v57_v6 }
  0xea   :  { %v1024_v9 = vpop.f32.mrf.mxu0 }
  0xeb   :  { %1115 = vtanh.f32 %v132_v8  ;;  %v959_v12 = vmul.f32 -1.442695, %v132_v8 }
  0xed   :  { %1117 = vpow2.f32 %v959_v12 }
  0xf8   :  { %v1116_v10 = vpop.eup %1115 }
  0xf9   :  { %146 = vrot.lane.b32.xlu0 %v1116_v10, %s1288_s18 }
  0xfa   :  { %v1118_v13 = vpop.eup %1117 }
  0xfb   :  { %v136_v14 = vadd.f32 1.0, %v1118_v13 }
  0xfd   :  { %141 = vrot.lane.b32.xlu0 %v56_v11, %s1295_s0  ;;  %1119 = vrcp.f32 %v136_v14 }
 0x10a   :  { %v1120_v15 = vpop.eup %1119 }
 0x16b   :  { %v147_v16 = vpop.permute.xlu0 %146 }
 0x16c   :  { %v149_v17 = vmul.f32 %v1120_v15, %v147_v16 }
 0x16e   :  { %151 = vrot.lane.b32.xlu1 %v149_v17, %s1295_s0 }
 0x16f   :  { %v142_v18 = vpop.permute.xlu0 %141 }
 0x170   :  { %v144_v19 = vmul.f32 %v1120_v15, %v142_v18 }
 0x1e0   :  { %v152_v20 = vpop.permute.xlu1 %151 }
 0x1e1   :  { %v154_v21 = vadd.f32 %v152_v20, %v144_v19 }
 0x1e3   :  { %1121 = vtanh.f32 %v154_v21 }
 0x1f0   :  { %v1122_v22 = vpop.eup %1121 }
 0x1f1   :  { %157 = vrot.lane.b32.xlu1 %v1122_v22, %s1288_s18 }
 0x263   :  { %v158_v23 = vpop.permute.xlu1 %157 }
 0x264   :  { %v160_v24 = vmul.f32 %v1120_v15, %v158_v23 }
 0x266   :  { %162 = vrot.lane.b32.xlu0 %v160_v24, %s1295_s0 }
 0x2d8   :  { %v163_v25 = vpop.permute.xlu0 %162 }
 0x2d9   :  { %166 = vst.msk [vmem:[#allocation9] sm:$0xf] %vm48_vm0, %v163_v25  ;;  %1034 = vmatmul.mubr.msk.f32.vlgmr.msra.gmra.mxu1 %vm58_vm2, %v163_v25 }
 0x2da   :  { %1048 = vmatpush3.msra.mxu1 %v1344_v1  ;;  %1055 = vmatprep.mubr.msk.f32.mxu1 %vm1294_vm1, %v1293_v0 }
 0x2db   :  { %1049 = vmatprep.subr.mxu1 %v1293_v0 }
 0x2dc   :  { %1050 = vmatpush3.msra.mxu1 %v1346_v2 }
 0x2dd   :  { %1051 = vmatprep.subr.mxu1 %v1293_v0 }
 0x2de   :  { %1052 = vmatpush3.msra.mxu1 %v1351_v3 }
 0x2df   :  { %1053 = vmatprep.subr.mxu1 %v1293_v0 }
 0x2e0   :  { %1054 = vmatpush3.msra.mxu1 %v1357_v4 }
 0x2e1   :  { %1069 = vmatprep.subr.mxu1 %v1293_v0 }
 0x399   :  { %v237_v27 = vpop.f32.mrf.mxu1 }
 0x39a   :  { %v241_v28 = vadd.f32 %v237_v27, %v168_v26 }
 0x39b   :  { %v1035_v29 = vpop.f32.mrf.mxu1 }
 0x39c   :  { %1123 = vtanh.f32 %v241_v28  ;;  %v961_v31 = vmul.f32 -1.442695, %v241_v28 }
 0x39e   :  { %1125 = vpow2.f32 %v961_v31 }
 0x3a9   :  { %v1124_v30 = vpop.eup %1123 }
 0x3aa   :  { %251 = vrot.lane.b32.xlu1 %v1124_v30, %s1288_s18 }
 0x3ab   :  { %v1126_v32 = vpop.eup %1125 }
 0x3ac   :  { %v245_v33 = vadd.f32 1.0, %v1126_v32 }
 0x3ae   :  { %1127 = vrcp.f32 %v245_v33 }
 0x3bb   :  { %v1128_v34 = vpop.eup %1127 }
 0x3bc   :  { %v249_v37 = vmul.f32 %v1128_v34, %v154_v21  ;;  %v483_v21 = vld [vmem:[#allocation4 + $0x10] sm:$0xf] }
 0x41c   :  { %v252_v35 = vpop.permute.xlu1 %251 }
 0x41d   :  { %v254_v36 = vmul.f32 %v1128_v34, %v252_v35 }
 0x41f   :  { %256 = vrot.lane.b32.xlu0 %v254_v36, %s1295_s0 }
 0x491   :  { %v257_v38 = vpop.permute.xlu0 %256 }
 0x492   :  { %v259_v39 = vadd.f32 %v257_v38, %v249_v37 }
 0x494   :  { %1129 = vtanh.f32 %v259_v39 }
 0x4a1   :  { %v1130_v40 = vpop.eup %1129 }
 0x4a2   :  { %262 = vrot.lane.b32.xlu1 %v1130_v40, %s1288_s18 }
 0x514   :  { %v263_v41 = vpop.permute.xlu1 %262 }
 0x515   :  { %v265_v42 = vmul.f32 %v1128_v34, %v263_v41 }
 0x517   :  { %267 = vrot.lane.b32.xlu0 %v265_v42, %s1295_s0 }
 0x589   :  { %v268_v43 = vpop.permute.xlu0 %267 }
 0x58a   :  { %271 = vst.msk [vmem:[#allocation9 + $0x4] sm:$0xf] %vm48_vm0, %v268_v43  ;;  %1045 = vmatmul.mubr.msk.f32.vlgmr.msra.gmra.mxu0 %vm58_vm2, %v268_v43 }
 0x58b   :  { %1059 = vmatpush3.msra.mxu0 %v1344_v1  ;;  %1066 = vmatprep.mubr.msk.f32.mxu0 %vm1294_vm1, %v1293_v0 }
 0x58c   :  { %1060 = vmatprep.subr.mxu0 %v1293_v0 }
 0x58d   :  { %1061 = vmatpush3.msra.mxu0 %v1346_v2 }
 0x58e   :  { %1062 = vmatprep.subr.mxu0 %v1293_v0 }
 0x58f   :  { %1063 = vmatpush3.msra.mxu0 %v1351_v3 }
 0x590   :  { %1064 = vmatprep.subr.mxu0 %v1293_v0 }
 0x591   :  { %1065 = vmatpush3.msra.mxu0 %v1357_v4 }
 0x592   :  { %1080 = vmatprep.subr.mxu0 %v1293_v0 }
 0x64a   :  { %v342_v45 = vpop.f32.mrf.mxu0 }
 0x64b   :  { %v346_v46 = vadd.f32 %v342_v45, %v273_v44 }
 0x64c   :  { %v1046_v47 = vpop.f32.mrf.mxu0 }
 0x64d   :  { %1131 = vtanh.f32 %v346_v46  ;;  %v963_v49 = vmul.f32 -1.442695, %v346_v46 }
 0x64f   :  { %1133 = vpow2.f32 %v963_v49 }
 0x65a   :  { %v1132_v48 = vpop.eup %1131 }
 0x65b   :  { %356 = vrot.lane.b32.xlu1 %v1132_v48, %s1288_s18 }
 0x65c   :  { %v1134_v50 = vpop.eup %1133 }
 0x65d   :  { %v350_v51 = vadd.f32 1.0, %v1134_v50 }
 0x65f   :  { %1135 = vrcp.f32 %v350_v51 }
 0x66c   :  { %v1136_v52 = vpop.eup %1135 }
 0x66d   :  { %v354_v55 = vmul.f32 %v1136_v52, %v259_v39  ;;  %v588_v39 = vld [vmem:[#allocation4 + $0x14] sm:$0xf] }
 0x6cd   :  { %v357_v53 = vpop.permute.xlu1 %356 }
 0x6ce   :  { %v359_v54 = vmul.f32 %v1136_v52, %v357_v53 }
 0x6d0   :  { %361 = vrot.lane.b32.xlu0 %v359_v54, %s1295_s0 }
 0x742   :  { %v362_v56 = vpop.permute.xlu0 %361 }
 0x743   :  { %v364_v57 = vadd.f32 %v362_v56, %v354_v55 }
 0x745   :  { %1137 = vtanh.f32 %v364_v57 }
 0x752   :  { %v1138_v58 = vpop.eup %1137 }
 0x753   :  { %367 = vrot.lane.b32.xlu1 %v1138_v58, %s1288_s18 }
 0x7c5   :  { %v368_v59 = vpop.permute.xlu1 %367 }
 0x7c6   :  { %v370_v60 = vmul.f32 %v1136_v52, %v368_v59  ;;  %v693_v52 = vld [vmem:[#allocation4 + $0x18] sm:$0xf] }
 0x7c8   :  { %372 = vrot.lane.b32.xlu0 %v370_v60, %s1295_s0 }
 0x83a   :  { %v373_v61 = vpop.permute.xlu0 %372 }
 0x83b   :  { %376 = vst.msk [vmem:[#allocation9 + $0x8] sm:$0xf] %vm48_vm0, %v373_v61  ;;  %1056 = vmatmul.mubr.msk.f32.vlgmr.msra.gmra.mxu1 %vm58_vm2, %v373_v61 }
 0x83c   :  { %1070 = vmatpush3.msra.mxu1 %v1344_v1  ;;  %1077 = vmatprep.mubr.msk.f32.mxu1 %vm1294_vm1, %v1293_v0 }
 0x83d   :  { %1071 = vmatprep.subr.mxu1 %v1293_v0 }
 0x83e   :  { %1072 = vmatpush3.msra.mxu1 %v1346_v2 }
 0x83f   :  { %1073 = vmatprep.subr.mxu1 %v1293_v0 }
 0x840   :  { %1074 = vmatpush3.msra.mxu1 %v1351_v3 }
 0x841   :  { %1075 = vmatprep.subr.mxu1 %v1293_v0 }
 0x842   :  { %1076 = vmatpush3.msra.mxu1 %v1357_v4 }
 0x843   :  { %1091 = vmatprep.subr.mxu1 %v1293_v0 }
 0x8fb   :  { %v447_v63 = vpop.f32.mrf.mxu1 }
 0x8fc   :  { %v451_v5 = vadd.f32 %v447_v63, %v378_v62 }
 0x8fd   :  { %v1057_v6 = vpop.f32.mrf.mxu1 }
 0x8fe   :  { %1139 = vtanh.f32 %v451_v5  ;;  %v965_v8 = vmul.f32 -1.442695, %v451_v5 }
 0x900   :  { %1141 = vpow2.f32 %v965_v8 }
 0x90b   :  { %v1140_v7 = vpop.eup %1139 }
 0x90c   :  { %461 = vrot.lane.b32.xlu1 %v1140_v7, %s1288_s18 }
 0x90d   :  { %v1142_v9 = vpop.eup %1141 }
 0x90e   :  { %v455_v10 = vadd.f32 1.0, %v1142_v9 }
 0x910   :  { %1143 = vrcp.f32 %v455_v10 }
 0x91d   :  { %v1144_v11 = vpop.eup %1143 }
 0x91e   :  { %v459_v14 = vmul.f32 %v1144_v11, %v364_v57 }
 0x97e   :  { %v462_v12 = vpop.permute.xlu1 %461 }
 0x97f   :  { %v464_v13 = vmul.f32 %v1144_v11, %v462_v12 }
 0x981   :  { %466 = vrot.lane.b32.xlu0 %v464_v13, %s1295_s0 }
 0x9f3   :  { %v467_v15 = vpop.permute.xlu0 %466 }
 0x9f4   :  { %v469_v16 = vadd.f32 %v467_v15, %v459_v14 }
 0x9f6   :  { %1145 = vtanh.f32 %v469_v16 }
 0xa03   :  { %v1146_v17 = vpop.eup %1145 }
 0xa04   :  { %472 = vrot.lane.b32.xlu1 %v1146_v17, %s1288_s18 }
 0xa76   :  { %v473_v18 = vpop.permute.xlu1 %472 }
 0xa77   :  { %v475_v19 = vmul.f32 %v1144_v11, %v473_v18  ;;  %v798_v11 = vld [vmem:[#allocation4 + $0x1c] sm:$0xf] }
 0xa79   :  { %477 = vrot.lane.b32.xlu0 %v475_v19, %s1295_s0 }
 0xaeb   :  { %v478_v20 = vpop.permute.xlu0 %477 }
 0xaec   :  { %481 = vst.msk [vmem:[#allocation9 + $0xc] sm:$0xf] %vm48_vm0, %v478_v20  ;;  %1067 = vmatmul.mubr.msk.f32.vlgmr.msra.gmra.mxu0 %vm58_vm2, %v478_v20 }
 0xaed   :  { %1081 = vmatpush3.msra.mxu0 %v1344_v1  ;;  %1088 = vmatprep.mubr.msk.f32.mxu0 %vm1294_vm1, %v1293_v0 }
 0xaee   :  { %1082 = vmatprep.subr.mxu0 %v1293_v0 }
 0xaef   :  { %1083 = vmatpush3.msra.mxu0 %v1346_v2 }
 0xaf0   :  { %1084 = vmatprep.subr.mxu0 %v1293_v0 }
 0xaf1   :  { %1085 = vmatpush3.msra.mxu0 %v1351_v3 }
 0xaf2   :  { %1086 = vmatprep.subr.mxu0 %v1293_v0 }
 0xaf3   :  { %1087 = vmatpush3.msra.mxu0 %v1357_v4 }
 0xbac   :  { %v552_v22 = vpop.f32.mrf.mxu0 }
 0xbad   :  { %v556_v23 = vadd.f32 %v552_v22, %v483_v21 }
 0xbae   :  { %v1068_v24 = vpop.f32.mrf.mxu0 }
 0xbaf   :  { %1147 = vtanh.f32 %v556_v23  ;;  %v967_v26 = vmul.f32 -1.442695, %v556_v23 }
 0xbb1   :  { %1149 = vpow2.f32 %v967_v26 }
 0xbbc   :  { %v1148_v25 = vpop.eup %1147 }
 0xbbd   :  { %566 = vrot.lane.b32.xlu1 %v1148_v25, %s1288_s18 }
 0xbbe   :  { %v1150_v27 = vpop.eup %1149 }
 0xbbf   :  { %v560_v28 = vadd.f32 1.0, %v1150_v27 }
 0xbc1   :  { %1151 = vrcp.f32 %v560_v28 }
 0xbce   :  { %v1152_v29 = vpop.eup %1151 }
 0xbcf   :  { %v564_v32 = vmul.f32 %v1152_v29, %v469_v16 }
 0xc2f   :  { %v567_v30 = vpop.permute.xlu1 %566 }
 0xc30   :  { %v569_v31 = vmul.f32 %v1152_v29, %v567_v30 }
 0xc32   :  { %571 = vrot.lane.b32.xlu0 %v569_v31, %s1295_s0 }
 0xca4   :  { %v572_v33 = vpop.permute.xlu0 %571 }
 0xca5   :  { %v574_v34 = vadd.f32 %v572_v33, %v564_v32 }
 0xca7   :  { %1153 = vtanh.f32 %v574_v34 }
 0xcb4   :  { %v1154_v35 = vpop.eup %1153 }
 0xcb5   :  { %577 = vrot.lane.b32.xlu1 %v1154_v35, %s1288_s18 }
 0xd27   :  { %v578_v36 = vpop.permute.xlu1 %577 }
 0xd28   :  { %v580_v37 = vmul.f32 %v1152_v29, %v578_v36 }
 0xd2a   :  { %582 = vrot.lane.b32.xlu0 %v580_v37, %s1295_s0 }
 0xd9c   :  { %v583_v38 = vpop.permute.xlu0 %582 }
 0xd9d   :  { %586 = vst.msk [vmem:[#allocation9 + $0x10] sm:$0xf] %vm48_vm0, %v583_v38  ;;  %1078 = vmatmul.mubr.msk.f32.vlgmr.msra.gmra.mxu1 %vm58_vm2, %v583_v38 }
 0xd9e   :  { %1092 = vmatpush3.msra.mxu1 %v1344_v1  ;;  %1099 = vmatprep.mubr.msk.f32.mxu1 %vm1294_vm1, %v1293_v0 }
 0xd9f   :  { %1093 = vmatprep.subr.mxu1 %v1293_v0 }
 0xda0   :  { %1094 = vmatpush3.msra.mxu1 %v1346_v2 }
 0xda1   :  { %1095 = vmatprep.subr.mxu1 %v1293_v0 }
 0xda2   :  { %1096 = vmatpush3.msra.mxu1 %v1351_v3 }
 0xda3   :  { %1097 = vmatprep.subr.mxu1 %v1293_v0 }
 0xda4   :  { %1098 = vmatpush3.msra.mxu1 %v1357_v4 }
 0xe5d   :  { %v657_v40 = vpop.f32.mrf.mxu1 }
 0xe5e   :  { %v661_v41 = vadd.f32 %v657_v40, %v588_v39 }
 0xe5f   :  { %v1079_v42 = vpop.f32.mrf.mxu1 }
 0xe60   :  { %1155 = vtanh.f32 %v661_v41  ;;  %v969_v43 = vmul.f32 -1.442695, %v661_v41 }
 0xe62   :  { %1157 = vpow2.f32 %v969_v43 }
 0xe6d   :  { %v1156_v1 = vpop.eup %1155 }
 0xe6e   :  { %671 = vrot.lane.b32.xlu1 %v1156_v1, %s1288_s18 }
 0xe6f   :  { %v1158_v44 = vpop.eup %1157 }
 0xe70   :  { %v665_v2 = vadd.f32 1.0, %v1158_v44 }
 0xe72   :  { %1159 = vrcp.f32 %v665_v2 }
 0xe7f   :  { %v1160_v45 = vpop.eup %1159 }
 0xe80   :  { %v669_v0 = vmul.f32 %v1160_v45, %v574_v34 }
 0xee0   :  { %v672_v46 = vpop.permute.xlu1 %671 }
 0xee1   :  { %v674_v3 = vmul.f32 %v1160_v45, %v672_v46 }
 0xee3   :  { %676 = vrot.lane.b32.xlu0 %v674_v3, %s1295_s0 }
 0xf55   :  { %v677_v4 = vpop.permute.xlu0 %676 }
 0xf56   :  { %v679_v47 = vadd.f32 %v677_v4, %v669_v0 }
 0xf58   :  { %1161 = vtanh.f32 %v679_v47 }
 0xf65   :  { %v1162_v48 = vpop.eup %1161 }
 0xf66   :  { %682 = vrot.lane.b32.xlu1 %v1162_v48, %s1288_s18 }
 0xfd8   :  { %v683_v49 = vpop.permute.xlu1 %682 }
 0xfd9   :  { %v685_v50 = vmul.f32 %v1160_v45, %v683_v49 }
 0xfdb   :  { %687 = vrot.lane.b32.xlu0 %v685_v50, %s1295_s0 }
0x104d   :  { %v688_v51 = vpop.permute.xlu0 %687 }
0x104e   :  { %691 = vst.msk [vmem:[#allocation9 + $0x14] sm:$0xf] %vm48_vm0, %v688_v51  ;;  %1089 = vmatmul.mubr.msk.f32.vlgmr.msra.gmra.mxu0 %vm58_vm2, %v688_v51 }
0x110e   :  { %v762_v53 = vpop.f32.mrf.mxu0 }
0x110f   :  { %v766_v54 = vadd.f32 %v762_v53, %v693_v52 }
0x1110   :  { %v1090_v55 = vpop.f32.mrf.mxu0 }
0x1111   :  { %1163 = vtanh.f32 %v766_v54  ;;  %v971_v57 = vmul.f32 -1.442695, %v766_v54 }
0x1113   :  { %1165 = vpow2.f32 %v971_v57 }
0x111e   :  { %v1164_v56 = vpop.eup %1163 }
0x111f   :  { %776 = vrot.lane.b32.xlu1 %v1164_v56, %s1288_s18 }
0x1120   :  { %v1166_v58 = vpop.eup %1165 }
0x1121   :  { %v770_v59 = vadd.f32 1.0, %v1166_v58 }
0x1123   :  { %1167 = vrcp.f32 %v770_v59 }
0x1130   :  { %v1168_v60 = vpop.eup %1167 }
0x1131   :  { %v774_v63 = vmul.f32 %v1168_v60, %v679_v47 }
0x1191   :  { %v777_v61 = vpop.permute.xlu1 %776 }
0x1192   :  { %v779_v62 = vmul.f32 %v1168_v60, %v777_v61 }
0x1194   :  { %781 = vrot.lane.b32.xlu0 %v779_v62, %s1295_s0 }
0x1206   :  { %v782_v5 = vpop.permute.xlu0 %781 }
0x1207   :  { %v784_v6 = vadd.f32 %v782_v5, %v774_v63 }
0x1209   :  { %1169 = vtanh.f32 %v784_v6 }
0x1216   :  { %v1170_v7 = vpop.eup %1169 }
0x1217   :  { %787 = vrot.lane.b32.xlu1 %v1170_v7, %s1288_s18 }
0x1289   :  { %v788_v8 = vpop.permute.xlu1 %787 }
0x128a   :  { %v790_v9 = vmul.f32 %v1168_v60, %v788_v8 }
0x128c   :  { %792 = vrot.lane.b32.xlu0 %v790_v9, %s1295_s0 }
0x12fe   :  { %v793_v10 = vpop.permute.xlu0 %792 }
0x12ff   :  { %796 = vst.msk [vmem:[#allocation9 + $0x18] sm:$0xf] %vm48_vm0, %v793_v10  ;;  %1100 = vmatmul.mubr.msk.f32.vlgmr.msra.gmra.mxu1 %vm58_vm2, %v793_v10 }
0x13bf   :  { %v867_v12 = vpop.f32.mrf.mxu1 }
0x13c0   :  { %v871_v13 = vadd.f32 %v867_v12, %v798_v11 }
0x13c1   :  { %v1101_v14 = vpop.f32.mrf.mxu1 }
0x13c2   :  { %1171 = vtanh.f32 %v871_v13  ;;  %v973_v16 = vmul.f32 -1.442695, %v871_v13 }
0x13c4   :  { %1173 = vpow2.f32 %v973_v16 }
0x13cf   :  { %v1172_v15 = vpop.eup %1171 }
0x13d0   :  { %881 = vrot.lane.b32.xlu1 %v1172_v15, %s1288_s18 }
0x13d1   :  { %v1174_v17 = vpop.eup %1173 }
0x13d2   :  { %v875_v18 = vadd.f32 1.0, %v1174_v17 }
0x13d4   :  { %1175 = vrcp.f32 %v875_v18 }
0x13e1   :  { %v1176_v19 = vpop.eup %1175 }
0x13e2   :  { %v879_v22 = vmul.f32 %v1176_v19, %v784_v6 }
0x1442   :  { %v882_v20 = vpop.permute.xlu1 %881 }
0x1443   :  { %v884_v21 = vmul.f32 %v1176_v19, %v882_v20 }
0x1445   :  { %886 = vrot.lane.b32.xlu0 %v884_v21, %s1295_s0 }
0x14b7   :  { %v887_v23 = vpop.permute.xlu0 %886 }
0x14b8   :  { %v889_v24 = vadd.f32 %v887_v23, %v879_v22 }
0x14ba   :  { %1177 = vtanh.f32 %v889_v24 }
0x14c7   :  { %v1178_v25 = vpop.eup %1177 }
0x14c8   :  { %892 = vrot.lane.b32.xlu1 %v1178_v25, %s1288_s18 }
0x14cc   :  { %904 = vrot.lane.b32.xlu1 %v889_v24, %s1296_s1 }
0x153a   :  { %v893_v26 = vpop.permute.xlu1 %892 }
0x153b   :  { %v895_v27 = vmul.f32 %v1176_v19, %v893_v26 }
0x153d   :  { %897 = vrot.lane.b32.xlu0 %v895_v27, %s1295_s0 }
0x153e   :  { %v905_v28 = vpop.permute.xlu1 %904 }
0x153f   :  { %907 = vst.msk [vmem:[#allocation3] sm:$0xf] %vm48_vm0, %v905_v28  ;;  %912 = vst.msk [vmem:[#allocation12] sm:$0xf] %vm48_vm0, %v905_v28 }
0x15af   :  { %v898_v29 = vpop.permute.xlu0 %897 }
0x15b0   :  { %901 = vst.msk [vmem:[#allocation9 + $0x1c] sm:$0xf] %vm48_vm0, %v898_v29  ;;  %902 = vst.msk [vmem:[#allocation2] sm:$0xf] %vm48_vm0, %v898_v29 }
0x15b1   :  { %911 = vst.msk [vmem:[#allocation10] sm:$0xf] %vm48_vm0, %v898_v29 }
0x15b2   :  { %1230 = shalt.err (!%p1227_p0)
}
0x15b3   :  { %934 = dma.vmem_to_hbm [thread:$0]  %s932_s30, 64, %s1494_s3, [#allocation11]  }
0x15b4   :  { %s1239_s12 = scalar_lea.vmem %s919_s6, 512  ;;  %p1244_p2 = scmp.lt.s32.totalorder %s919_s6, %s919_s6 }
0x15b5   :  { %p1240_p1 = scmp.ne.s32.totalorder %s919_s6, %s1239_s12  ;;  %p1245_p3 = scmp.lt.s32.totalorder %s1239_s12, %s1239_s12 }
0x15b7   :  { %p1246_p4 = por %p1245_p3, %p1244_p2 }
0x15b9   :  { %p1247_p5 = pnand %p1246_p4, %p1240_p1 }
0x15bb   :  { %1250 = shalt.err (!%p1247_p5)
}
0x15bc   :  { %924 = dma.vmem_to_hbm [thread:$0]  %s919_s6, 512, %s1493_s2, [#allocation6], %s1288_s18, %s1288_s18, %s1289_s19  }
0x15bd   :  { %s1259_s15 = scalar_lea.vmem %s942_s8, 64  ;;  %p1264_p7 = scmp.lt.s32.totalorder %s942_s8, %s942_s8 }
0x15be   :  { %p1260_p6 = scmp.ne.s32.totalorder %s942_s8, %s1259_s15  ;;  %p1265_p8 = scmp.lt.s32.totalorder %s1259_s15, %s1259_s15 }
0x15c0   :  { %p1266_p9 = por %p1265_p8, %p1264_p7 }
0x15c2   :  { %p1267_p10 = pnand %p1266_p9, %p1260_p6 }
0x15c4   :  { %1270 = shalt.err (!%p1267_p10)
}
0x15c5   :  { %944 = dma.vmem_to_hbm [thread:$0]  %s942_s8, 64, %s1495_s4, [#allocation11]  }
0x15c6   :  { %1283 = dma.done.wait [#allocation6], 512  }
0x15c7   :  { %1284 = vsyncadd [#allocation6], 4294966784 }
0x15c8   :  { %1285 = dma.done.wait [#allocation11], 128  }
0x15c9   :  { %1286 = vsyncadd [#allocation11], 4294967168 }
0x15ca   :  { %954 = vsyncpa [#allocation5], 1 }
0x15cb   :  { %955 = vsyncpa [#allocation8], 1 }
0x15cc   :  { %956 = vsyncpa [#allocation6], 1 }
0x15cd   :  { %957 = vsyncpa [#allocation11], 1 }

</bundles_post_ra>
